<compile_context>
chip_gen: v6e
topology: v6e:2x2x1
jax: 0.10.0
libtpu: 0.0.40
codegen_flags: <defaults>
</compile_context>

<pallas_src>
import functools

import jax
import jax.numpy as jnp
from jax import lax
from jax.experimental import pallas as pl
from jax.experimental.pallas import tpu as pltpu


def _round_up(n, m):
    return ((n + m - 1) // m) * m


def _pad2(a, rows, cols):
    return jnp.pad(a, ((0, rows - a.shape[0]), (0, cols - a.shape[1])))


def vae_kernel(
    F,                       # static: true feature count (lane index of eps / mu)
    x_ref,                   # [TB, Fxp]  lanes 0..F-1 = x, lane F = eps, rest 0
    w1_ref, b1_ref,          # [Fxp, Hp], [1, Hp]
    wml_ref, bml_ref,        # [Hp, Lp],  [1, Lp]   (fused fc21/fc22)
    w3_ref, b3_ref,          # [1, Hp],   [1, Hp]
    w4_ref, b4_ref,          # [Hp, Fop], [1, Fop]
    out_ref,                 # [TB, Fop]  lanes 0..F-1 = recon, F = mu, F+1 = logvar
):
    x = x_ref[...]                                            # [TB, Fxp]
    eps = x[:, F:F + 1]                                       # [TB, 1]

    # encode: h1 = relu(x @ W1 + b1)      (MXU, f32 accumulate)
    # rows F..Fxp-1 of W1 are zero, so the eps lane contributes nothing.
    h1 = jnp.dot(x, w1_ref[...], preferred_element_type=jnp.float32) + b1_ref[...]
    h1 = jnp.maximum(h1, 0.0)                                 # [TB, Hp]

    # fused fc21 / fc22: one matmul, mu in lane 0, logvar in lane 1
    mulv = jnp.dot(h1, wml_ref[...], preferred_element_type=jnp.float32) + bml_ref[...]
    mu = mulv[:, 0:1]                                         # [TB, 1]
    logvar = mulv[:, 1:2]                                     # [TB, 1]

    # reparametrize: std = exp(logvar * 1e-5); z = eps * std + mu
    std = jnp.exp(logvar * 1e-05)
    z = eps * std + mu                                        # [TB, 1]

    # fc3 has K=1: VPU broadcast outer-product (no MXU round-trip)
    h3 = jnp.maximum(z * w3_ref[...] + b3_ref[...], 0.0)      # [TB, Hp]

    # decode: recon = h3 @ W4 + b4        (MXU).  Lanes F.. of W4/b4 are zero,
    # so recon's tail lanes are exactly zero -> safe to pack mu/logvar there.
    recon = jnp.dot(h3, w4_ref[...], preferred_element_type=jnp.float32) + b4_ref[...]

    lane = lax.broadcasted_iota(jnp.int32, recon.shape, 1)
    out = recon + jnp.where(lane == F, mu, 0.0) + jnp.where(lane == F + 1, logvar, 0.0)
    out_ref[...] = out                                        # single lane-dense store


@functools.partial(jax.jit, static_argnames=("tb",))
def vae_forward(x, eps, params, *, tb=512):
    """x: [B, input_dim] f32, eps: [B, 1] f32, params: dict of weights/biases."""
    B, F = x.shape
    H = params["w1"].shape[1]          # 80
    Hp = _round_up(H, 128)             # lane-pad hidden
    Fxp = _round_up(F + 1, 128)        # input slab: features + eps lane, lane-padded
    Fop = _round_up(F + 2, 128)        # output slab: recon + mu + logvar, lane-padded
    Lp = 128                           # fused mu/logvar matmul width

    TB = min(tb, _round_up(B, 8))      # batch tile (multiple of 8 sublanes)
    B_pad = _round_up(B, TB)

    # ---- pack eps into lane F of the input slab; pad with exact zeros ----
    xe = jnp.concatenate([x, eps[:, :1]], axis=1)             # [B, F+1]
    xp = _pad2(xe, B_pad, Fxp)

    w1p = _pad2(params["w1"], Fxp, Hp)                        # rows F.. are zero
    b1p = _pad2(params["b1"], 1, Hp)
    wml = _pad2(jnp.concatenate([params["w21"], params["w22"]], axis=1), Hp, Lp)
    bml = _pad2(jnp.concatenate([params["b21"], params["b22"]], axis=1), 1, Lp)
    w3p = _pad2(params["w3"], 1, Hp)                          # fc3 weight as one row
    b3p = _pad2(params["b3"], 1, Hp)
    w4p = _pad2(params["w4"], Hp, Fop)                        # cols F.. are zero
    b4p = _pad2(params["b4"], 1, Fop)

    grid = (B_pad // TB,)

    def batch_spec(shape):
        return pl.BlockSpec(shape, lambda i: (i, 0))

    def resident(shape):   # weights: same block every grid step -> VMEM-resident
        return pl.BlockSpec(shape, lambda i: (0, 0))

    out = pl.pallas_call(
        functools.partial(vae_kernel, F),
        out_shape=jax.ShapeDtypeStruct((B_pad, Fop), jnp.float32),
        grid=grid,
        in_specs=[
            batch_spec((TB, Fxp)),                    # x (+ packed eps)
            resident((Fxp, Hp)), resident((1, Hp)),   # w1, b1
            resident((Hp, Lp)), resident((1, Lp)),    # w_mu_logvar, b_mu_logvar
            resident((1, Hp)), resident((1, Hp)),     # w3 (row), b3
            resident((Hp, Fop)), resident((1, Fop)),  # w4, b4
        ],
        out_specs=batch_spec((TB, Fop)),
        compiler_params=pltpu.CompilerParams(
            dimension_semantics=("parallel",),        # shard batch tiles across TCs (v7x)
        ),
    )(xp, w1p, b1p, wml, bml, w3p, b3p, w4p, b4p)

    recon = out[:B, :F]
    mu = out[:B, F:F + 1]
    logvar = out[:B, F + 1:F + 2]
    return recon, mu, logvar


def init_params(key, input_dim=100, hidden=80, latent=1):
    """Deterministic PyTorch-style (uniform +-1/sqrt(fan_in)) init."""
    def linear(key, fan_in, fan_out):
        kw, kb = jax.random.split(key)
        bound = 1.0 / jnp.sqrt(fan_in)
        w = jax.random.uniform(kw, (fan_in, fan_out), jnp.float32, -bound, bound)
        b = jax.random.uniform(kb, (1, fan_out), jnp.float32, -bound, bound)
        return w, b

    k1, k21, k22, k3, k4 = jax.random.split(key, 5)
    w1, b1 = linear(k1, input_dim, hidden)
    w21, b21 = linear(k21, hidden, latent)
    w22, b22 = linear(k22, hidden, latent)
    w3, b3 = linear(k3, latent, hidden)
    w4, b4 = linear(k4, hidden, input_dim)
    return dict(w1=w1, b1=b1, w21=w21, b21=b21, w22=w22, b22=b22,
                w3=w3, b3=b3, w4=w4, b4=b4)


def vae_forward_ref(x, eps, p):
    """Pure-JAX reference of the PyTorch forward."""
    h1 = jnp.maximum(x @ p["w1"] + p["b1"], 0.0)
    mu = h1 @ p["w21"] + p["b21"]
    logvar = h1 @ p["w22"] + p["b22"]
    std = jnp.exp(logvar * 1e-05)
    z = eps * std + mu
    # z @ w3 with K=1 is exactly the broadcast product z * w3 (same math as torch).
    h3 = jnp.maximum(z * p["w3"] + p["b3"], 0.0)
    return h3 @ p["w4"] + p["b4"], mu, logvar


if __name__ == "__main__":
    key = jax.random.PRNGKey(0)
    k_params, k_x, k_eps = jax.random.split(key, 3)

    # Small demo shapes; B is deliberately not a multiple of the batch tile so
    # the padding + multi-step grid path is exercised.
    B, INPUT_DIM = 50, 100
    params = init_params(k_params, input_dim=INPUT_DIM)
    x = jax.random.normal(k_x, (B, INPUT_DIM), jnp.float32)
    eps = jax.random.normal(k_eps, (B, 1), jnp.float32)

    recon, mu, logvar = jax.block_until_ready(vae_forward(x, eps, params, tb=32))

    # correctness check against pure-JAX reference
    recon_ref, mu_ref, logvar_ref = vae_forward_ref(x, eps, params)
    assert recon.shape == (B, INPUT_DIM) and mu.shape == (B, 1) and logvar.shape == (B, 1)
    assert jnp.allclose(recon, recon_ref, atol=1e-4, rtol=1e-4)
    assert jnp.allclose(mu, mu_ref, atol=1e-4, rtol=1e-4)
    assert jnp.allclose(logvar, logvar_ref, atol=1e-4, rtol=1e-4)

    print("KERNEL_OK")
</pallas_src>

<mosaic_0001>
module attributes {stable_mosaic.version = 11 : i64} {
  func.func @vae_kernel(%arg0: i32, %arg1: memref<32x128xf32, #tpu.memory_space<vmem>>, %arg2: memref<128x128xf32, #tpu.memory_space<vmem>>, %arg3: memref<1x128xf32, #tpu.memory_space<vmem>>, %arg4: memref<128x128xf32, #tpu.memory_space<vmem>>, %arg5: memref<1x128xf32, #tpu.memory_space<vmem>>, %arg6: memref<1x128xf32, #tpu.memory_space<vmem>>, %arg7: memref<1x128xf32, #tpu.memory_space<vmem>>, %arg8: memref<128x128xf32, #tpu.memory_space<vmem>>, %arg9: memref<1x128xf32, #tpu.memory_space<vmem>>, %arg10: memref<32x128xf32, #tpu.memory_space<vmem>>) attributes {dimension_semantics = [#tpu.dimension_semantics<parallel>], iteration_bounds = array<i64: 2>, scalar_prefetch = 0 : i64, scratch_operands = 0 : i64, tpu.core_type = #tpu.core_type<tc>, window_params = [{transform_indices = @transform_0, window_bounds = array<i64: 32, 128>}, {pipeline_mode = #tpu.pipeline_mode<synchronous>, transform_indices = @transform_1, window_bounds = array<i64: 128, 128>}, {pipeline_mode = #tpu.pipeline_mode<synchronous>, transform_indices = @transform_2, window_bounds = array<i64: 1, 128>}, {pipeline_mode = #tpu.pipeline_mode<synchronous>, transform_indices = @transform_3, window_bounds = array<i64: 128, 128>}, {pipeline_mode = #tpu.pipeline_mode<synchronous>, transform_indices = @transform_4, window_bounds = array<i64: 1, 128>}, {pipeline_mode = #tpu.pipeline_mode<synchronous>, transform_indices = @transform_5, window_bounds = array<i64: 1, 128>}, {pipeline_mode = #tpu.pipeline_mode<synchronous>, transform_indices = @transform_6, window_bounds = array<i64: 1, 128>}, {pipeline_mode = #tpu.pipeline_mode<synchronous>, transform_indices = @transform_7, window_bounds = array<i64: 128, 128>}, {pipeline_mode = #tpu.pipeline_mode<synchronous>, transform_indices = @transform_8, window_bounds = array<i64: 1, 128>}, {transform_indices = @transform_9, window_bounds = array<i64: 32, 128>}]} {
    %c0 = arith.constant 0 : index
    %c0_0 = arith.constant 0 : index
    %0 = vector.load %arg1[%c0, %c0_0] : memref<32x128xf32, #tpu.memory_space<vmem>>, vector<32x128xf32>
    %1 = vector.extract_strided_slice %0 {offsets = [0, 100], sizes = [32, 1], strides = [1, 1]} : vector<32x128xf32> to vector<32x1xf32>
    %c0_1 = arith.constant 0 : index
    %c0_2 = arith.constant 0 : index
    %2 = vector.load %arg2[%c0_1, %c0_2] : memref<128x128xf32, #tpu.memory_space<vmem>>, vector<128x128xf32>
    %cst = arith.constant dense<0.000000e+00> : vector<32x128xf32>
    %3 = tpu.matmul %0, %2, %cst {dimension_numbers = #tpu.dot_dimension_numbers<[1], [0], [0], [1], [0, 0, 1, 1], [], []>} : vector<32x128xf32>, vector<128x128xf32>, vector<32x128xf32> -> vector<32x128xf32>
    %c0_3 = arith.constant 0 : index
    %c0_4 = arith.constant 0 : index
    %4 = vector.load %arg3[%c0_3, %c0_4] : memref<1x128xf32, #tpu.memory_space<vmem>>, vector<1x128xf32>
    %5 = vector.broadcast %4 : vector<1x128xf32> to vector<32x128xf32>
    %6 = arith.addf %3, %5 : vector<32x128xf32>
    %cst_5 = arith.constant 0.000000e+00 : f32
    %7 = vector.broadcast %cst_5 : f32 to vector<32x128xf32>
    %8 = arith.maximumf %6, %7 : vector<32x128xf32>
    %c0_6 = arith.constant 0 : index
    %c0_7 = arith.constant 0 : index
    %9 = vector.load %arg4[%c0_6, %c0_7] : memref<128x128xf32, #tpu.memory_space<vmem>>, vector<128x128xf32>
    %cst_8 = arith.constant dense<0.000000e+00> : vector<32x128xf32>
    %10 = tpu.matmul %8, %9, %cst_8 {dimension_numbers = #tpu.dot_dimension_numbers<[1], [0], [0], [1], [0, 0, 1, 1], [], []>} : vector<32x128xf32>, vector<128x128xf32>, vector<32x128xf32> -> vector<32x128xf32>
    %c0_9 = arith.constant 0 : index
    %c0_10 = arith.constant 0 : index
    %11 = vector.load %arg5[%c0_9, %c0_10] : memref<1x128xf32, #tpu.memory_space<vmem>>, vector<1x128xf32>
    %12 = vector.broadcast %11 : vector<1x128xf32> to vector<32x128xf32>
    %13 = arith.addf %10, %12 : vector<32x128xf32>
    %14 = vector.extract_strided_slice %13 {offsets = [0, 0], sizes = [32, 1], strides = [1, 1]} : vector<32x128xf32> to vector<32x1xf32>
    %15 = vector.extract_strided_slice %13 {offsets = [0, 1], sizes = [32, 1], strides = [1, 1]} : vector<32x128xf32> to vector<32x1xf32>
    %cst_11 = arith.constant 9.99999974E-6 : f32
    %16 = vector.broadcast %cst_11 : f32 to vector<32x1xf32>
    %17 = arith.mulf %15, %16 : vector<32x1xf32>
    %18 = math.exp %17 : vector<32x1xf32>
    %19 = arith.mulf %1, %18 : vector<32x1xf32>
    %20 = arith.addf %19, %14 : vector<32x1xf32>
    %c0_12 = arith.constant 0 : index
    %c0_13 = arith.constant 0 : index
    %21 = vector.load %arg6[%c0_12, %c0_13] : memref<1x128xf32, #tpu.memory_space<vmem>>, vector<1x128xf32>
    %22 = vector.broadcast %20 : vector<32x1xf32> to vector<32x128xf32>
    %23 = vector.broadcast %21 : vector<1x128xf32> to vector<32x128xf32>
    %24 = arith.mulf %22, %23 : vector<32x128xf32>
    %c0_14 = arith.constant 0 : index
    %c0_15 = arith.constant 0 : index
    %25 = vector.load %arg7[%c0_14, %c0_15] : memref<1x128xf32, #tpu.memory_space<vmem>>, vector<1x128xf32>
    %26 = vector.broadcast %25 : vector<1x128xf32> to vector<32x128xf32>
    %27 = arith.addf %24, %26 : vector<32x128xf32>
    %cst_16 = arith.constant 0.000000e+00 : f32
    %28 = vector.broadcast %cst_16 : f32 to vector<32x128xf32>
    %29 = arith.maximumf %27, %28 : vector<32x128xf32>
    %c0_17 = arith.constant 0 : index
    %c0_18 = arith.constant 0 : index
    %30 = vector.load %arg8[%c0_17, %c0_18] : memref<128x128xf32, #tpu.memory_space<vmem>>, vector<128x128xf32>
    %cst_19 = arith.constant dense<0.000000e+00> : vector<32x128xf32>
    %31 = tpu.matmul %29, %30, %cst_19 {dimension_numbers = #tpu.dot_dimension_numbers<[1], [0], [0], [1], [0, 0, 1, 1], [], []>} : vector<32x128xf32>, vector<128x128xf32>, vector<32x128xf32> -> vector<32x128xf32>
    %c0_20 = arith.constant 0 : index
    %c0_21 = arith.constant 0 : index
    %32 = vector.load %arg9[%c0_20, %c0_21] : memref<1x128xf32, #tpu.memory_space<vmem>>, vector<1x128xf32>
    %33 = vector.broadcast %32 : vector<1x128xf32> to vector<32x128xf32>
    %34 = arith.addf %31, %33 : vector<32x128xf32>
    %35 = tpu.iota {dimensions = array<i32: 1>} : vector<32x128xi32>
    %c100_i32 = arith.constant 100 : i32
    %36 = vector.broadcast %c100_i32 : i32 to vector<32x128xi32>
    %37 = arith.cmpi eq, %35, %36 : vector<32x128xi32>
    %cst_22 = arith.constant 0.000000e+00 : f32
    %38 = vector.shape_cast %14 : vector<32x1xf32> to vector<32x1xf32>
    %39 = vector.broadcast %38 : vector<32x1xf32> to vector<32x128xf32>
    %40 = vector.broadcast %cst_22 : f32 to vector<32x128xf32>
    %41 = arith.select %37, %39, %40 : vector<32x128xi1>, vector<32x128xf32>
    %42 = arith.addf %34, %41 : vector<32x128xf32>
    %c101_i32 = arith.constant 101 : i32
    %43 = vector.broadcast %c101_i32 : i32 to vector<32x128xi32>
    %44 = arith.cmpi eq, %35, %43 : vector<32x128xi32>
    %cst_23 = arith.constant 0.000000e+00 : f32
    %45 = vector.shape_cast %15 : vector<32x1xf32> to vector<32x1xf32>
    %46 = vector.broadcast %45 : vector<32x1xf32> to vector<32x128xf32>
    %47 = vector.broadcast %cst_23 : f32 to vector<32x128xf32>
    %48 = arith.select %44, %46, %47 : vector<32x128xi1>, vector<32x128xf32>
    %49 = arith.addf %42, %48 : vector<32x128xf32>
    %c0_24 = arith.constant 0 : index
    %c0_25 = arith.constant 0 : index
    %50 = vector.load %arg10[%c0_24, %c0_25] : memref<32x128xf32, #tpu.memory_space<vmem>>, vector<32x128xf32>
    tpu.vector_store %arg10[%c0_24, %c0_25], %49 {strides = array<i32>} : memref<32x128xf32, #tpu.memory_space<vmem>>, vector<32x128xf32>,
    return
  }
  func.func @transform_0(%arg0: i32) -> (i32, i32) {
    %c0_i32 = arith.constant 0 : i32
    %c0_i32_0 = arith.constant 0 : i32
    return %arg0, %c0_i32 : i32, i32
  }
  func.func @transform_1(%arg0: i32) -> (i32, i32) {
    %c0_i32 = arith.constant 0 : i32
    %c0_i32_0 = arith.constant 0 : i32
    %c0_i32_1 = arith.constant 0 : i32
    return %c0_i32, %c0_i32_0 : i32, i32
  }
  func.func @transform_2(%arg0: i32) -> (i32, i32) {
    %c0_i32 = arith.constant 0 : i32
    %c0_i32_0 = arith.constant 0 : i32
    %c0_i32_1 = arith.constant 0 : i32
    return %c0_i32, %c0_i32_0 : i32, i32
  }
  func.func @transform_3(%arg0: i32) -> (i32, i32) {
    %c0_i32 = arith.constant 0 : i32
    %c0_i32_0 = arith.constant 0 : i32
    %c0_i32_1 = arith.constant 0 : i32
    return %c0_i32, %c0_i32_0 : i32, i32
  }
  func.func @transform_4(%arg0: i32) -> (i32, i32) {
    %c0_i32 = arith.constant 0 : i32
    %c0_i32_0 = arith.constant 0 : i32
    %c0_i32_1 = arith.constant 0 : i32
    return %c0_i32, %c0_i32_0 : i32, i32
  }
  func.func @transform_5(%arg0: i32) -> (i32, i32) {
    %c0_i32 = arith.constant 0 : i32
    %c0_i32_0 = arith.constant 0 : i32
    %c0_i32_1 = arith.constant 0 : i32
    return %c0_i32, %c0_i32_0 : i32, i32
  }
  func.func @transform_6(%arg0: i32) -> (i32, i32) {
    %c0_i32 = arith.constant 0 : i32
    %c0_i32_0 = arith.constant 0 : i32
    %c0_i32_1 = arith.constant 0 : i32
    return %c0_i32, %c0_i32_0 : i32, i32
  }
  func.func @transform_7(%arg0: i32) -> (i32, i32) {
    %c0_i32 = arith.constant 0 : i32
    %c0_i32_0 = arith.constant 0 : i32
    %c0_i32_1 = arith.constant 0 : i32
    return %c0_i32, %c0_i32_0 : i32, i32
  }
  func.func @transform_8(%arg0: i32) -> (i32, i32) {
    %c0_i32 = arith.constant 0 : i32
    %c0_i32_0 = arith.constant 0 : i32
    %c0_i32_1 = arith.constant 0 : i32
    return %c0_i32, %c0_i32_0 : i32, i32
  }
  func.func @transform_9(%arg0: i32) -> (i32, i32) {
    %c0_i32 = arith.constant 0 : i32
    %c0_i32_0 = arith.constant 0 : i32
    return %arg0, %c0_i32 : i32, i32
  }
}

</mosaic_0001>

<bundles_post_ra>
// kernel: vae_forward.1
= control target key start
LH: loop header
LB: loop body
LE: loop exit
PB: predicated region body
PF: predicated region fallthrough
CT: control target
= control target key end

     0   :  { %s1190_s30 = smov 0   ;;  %s1431_s0 = inlined_call_operand.vmem [shape: f32[64,128], index: 0, kind: input, shape index: {}]   ;;  %s1432_s1 = inlined_call_operand.vmem [shape: f32[128,128], index: 1, kind: input, shape index: {}]   ;;  %s1433_s2 = inlined_call_operand.vmem [shape: f32[1,128], index: 2, kind: input, shape index: {}]   ;;  %s1434_s3 = inlined_call_operand.vmem [shape: f32[128,128], index: 3, kind: input, shape index: {}]   ;;  %s1435_s4 = inlined_call_operand.vmem [shape: f32[1,128], index: 4, kind: input, shape index: {}]   ;;  %s1436_s5 = inlined_call_operand.vmem [shape: f32[1,128], index: 5, kind: input, shape index: {}]   ;;  %s1437_s6 = inlined_call_operand.vmem [shape: f32[1,128], index: 6, kind: input, shape index: {}]   ;;  %s1438_s7 = inlined_call_operand.vmem [shape: f32[128,128], index: 7, kind: input, shape index: {}]   ;;  %s1439_s8 = inlined_call_operand.vmem [shape: f32[1,128], index: 8, kind: input, shape index: {}]   ;;  %s1440_s9 = inlined_call_operand.vmem [shape: f32[64,128], index: 9, kind: output, shape index: {}]  }
   0x1 LB: > { %s878_s10 = sadd.s32 4294967295, %s1133_s30   ;;  %p882_p0 = scmp.ge.s32.totalorder %s1133_s30, 1  ;;  %s1133_s30 = sphi %s1190_s30, %s19_s30  }
   0x2   : > { %p288_p1 = scmp.lt.s32.totalorder %s1133_s30, 3 }
   0x4   : > { %p289_p2 = pnand %p882_p0, %p288_p1 }
   0x5   : > { %s883_s15 = sshll.u32 (!%p289_p2), %s878_s10, 2  ;;  %s1135_s12 = smov (!%p289_p2), 100  }
   0x6   : > { %292 = sbr.rel (%p289_p2) target bundleno = 919 (0x397), region = 56  ;;  %p325_p3 = scmp.lt.s32.totalorder (!%p289_p2), %s883_s15, 7 }
   0x7   : > { %s1137_s13 = smov (!%p289_p2), 99  }
   0xb   : > { %v355_v0 = vld [vmem:[%s1432_s1 + $0x78] sm:$0xff]  ;;  %v354_v1 = vld [vmem:[%s1432_s1 + $0x70] sm:$0xff]  ;;  %v353_v2 = vld [vmem:[%s1432_s1 + $0x68] sm:$0xff]  ;;  %s1442_s15 = smov (!%p325_p3, %s883_s15), 7 }
   0xc   : > { %954 = vmatprep.subr.mxu0 %v355_v0  ;;  %v352_v3 = vld [vmem:[%s1432_s1 + $0x60] sm:$0xff]  ;;  %s884_s20 = sshll.u32 %s1442_s15, 3  ;;  %v467_v4 = vld [vmem:[%s1434_s3 + $0x78] sm:$0xff]  ;;  %v466_v6 = vld [vmem:[%s1434_s3 + $0x70] sm:$0xff] }
   0xd   : > { %955 = vmatpush3.msra.mxu0 %v355_v0  ;;  %v351_v5 = vld [vmem:[%s1432_s1 + $0x58] sm:$0xff]  ;;  %s1224_s27 = scalar_lea.vmem %s1431_s0, %s884_s20  ;;  %992 = vmatprep.subr.mxu1 %v467_v4  ;;  %v350_v8 = vld [vmem:[%s1432_s1 + $0x50] sm:$0xff]  ;;  %v465_v9 = vld [vmem:[%s1434_s3 + $0x68] sm:$0xff]  ;;  %s334_s19 = scalar_lea.vmem %s1440_s9, %s884_s20 }
   0xe   : > { %956 = vmatprep.subr.mxu0 %v354_v1  ;;  %v1230_v7 = vld [vmem:[%s1224_s27] sm:$0xff]  ;;  %993 = vmatpush3.msra.mxu1 %v467_v4  ;;  %v349_v10 = vld [vmem:[%s1432_s1 + $0x48] sm:$0xff]  ;;  %v463_v13 = vld [vmem:[%s1434_s3 + $0x58] sm:$0xff] }
   0xf   : > { %957 = vmatpush3.msra.mxu0 %v354_v1  ;;  %986 = vmatprep.mubr.f32.mxu0 %v1230_v7  ;;  %v464_v11 = vld [vmem:[%s1434_s3 + $0x60] sm:$0xff]  ;;  %v347_v14 = vld [vmem:[%s1432_s1 + $0x38] sm:$0xff]  ;;  %v462_v15 = vld [vmem:[%s1434_s3 + $0x50] sm:$0xff] }
  0x10   : > { %958 = vmatprep.subr.mxu0 %v353_v2  ;;  %994 = vmatprep.subr.mxu1 %v466_v6  ;;  %v348_v12 = vld [vmem:[%s1432_s1 + $0x40] sm:$0xff]  ;;  %v346_v16 = vld [vmem:[%s1432_s1 + $0x30] sm:$0xff]  ;;  %v461_v17 = vld [vmem:[%s1434_s3 + $0x48] sm:$0xff] }
  0x11   : > { %959 = vmatpush3.msra.mxu0 %v353_v2  ;;  %995 = vmatpush3.msra.mxu1 %v466_v6  ;;  %v345_v18 = vld [vmem:[%s1432_s1 + $0x28] sm:$0xff]  ;;  %v460_v19 = vld [vmem:[%s1434_s3 + $0x40] sm:$0xff]  ;;  %v459_v21 = vld [vmem:[%s1434_s3 + $0x38] sm:$0xff]  ;;  %v1136_v2 = vmov 100  }
  0x12   : > { %960 = vmatprep.subr.mxu0 %v352_v3  ;;  %996 = vmatprep.subr.mxu1 %v465_v9  ;;  %v344_v20 = vld [vmem:[%s1432_s1 + $0x20] sm:$0xff]  ;;  %v343_v22 = vld [vmem:[%s1432_s1 + $0x18] sm:$0xff]  ;;  %v458_v23 = vld [vmem:[%s1434_s3 + $0x30] sm:$0xff] }
  0x13   : > { %961 = vmatpush3.msra.mxu0 %v352_v3  ;;  %997 = vmatpush3.msra.mxu1 %v465_v9  ;;  %v342_v24 = vld [vmem:[%s1432_s1 + $0x10] sm:$0xff]  ;;  %v457_v25 = vld [vmem:[%s1434_s3 + $0x28] sm:$0xff]  ;;  %v456_v27 = vld [vmem:[%s1434_s3 + $0x20] sm:$0xff] }
  0x14   : > { %962 = vmatprep.subr.mxu0 %v351_v5  ;;  %998 = vmatprep.subr.mxu1 %v464_v11  ;;  %v341_v26 = vld [vmem:[%s1432_s1 + $0x8] sm:$0xff]  ;;  %v340_v28 = vld [vmem:[%s1432_s1] sm:$0xff]  ;;  %v1300_v30 = vld [vmem:[%s1224_s27 + $0x10] sm:$0xff] }
  0x15   : > { %963 = vmatpush3.msra.mxu0 %v351_v5  ;;  %999 = vmatpush3.msra.mxu1 %v464_v11  ;;  %v1297_v29 = vld [vmem:[%s1224_s27 + $0x8] sm:$0xff]  ;;  %v1305_v31 = vld [vmem:[%s1224_s27 + $0x18] sm:$0xff]  ;;  %v454_v33 = vld [vmem:[%s1434_s3 + $0x10] sm:$0xff] }
  0x16   : > { %964 = vmatprep.subr.mxu0 %v350_v8  ;;  %1000 = vmatprep.subr.mxu1 %v463_v13  ;;  %v455_v32 = vld [vmem:[%s1434_s3 + $0x18] sm:$0xff]  ;;  %v453_v34 = vld [vmem:[%s1434_s3 + $0x8] sm:$0xff]  ;;  %v452_v35 = vld [vmem:[%s1434_s3] sm:$0xff] }
  0x17   : > { %965 = vmatpush3.msra.mxu0 %v350_v8  ;;  %1001 = vmatpush3.msra.mxu1 %v463_v13  ;;  %v887_v36 = vld [vmem:[%s1433_s2] ss:$0 sm:$0xff]  ;;  %v673_v8 = vld [vmem:[%s1438_s7 + $0x78] sm:$0xff]  ;;  %v672_v9 = vld [vmem:[%s1438_s7 + $0x70] sm:$0xff] }
  0x18   : > { %966 = vmatprep.subr.mxu0 %v349_v10  ;;  %1002 = vmatprep.subr.mxu1 %v462_v15  ;;  %v888_v49 = vld [vmem:[%s1435_s4] ss:$0 sm:$0xff]  ;;  %v668_v13 = vld [vmem:[%s1438_s7 + $0x50] sm:$0xff] }
  0x19   : > { %967 = vmatpush3.msra.mxu0 %v349_v10  ;;  %1003 = vmatpush3.msra.mxu1 %v462_v15  ;;  %v671_v10 = vld [vmem:[%s1438_s7 + $0x68] sm:$0xff]  ;;  %v670_v11 = vld [vmem:[%s1438_s7 + $0x60] sm:$0xff] }
  0x1a   : > { %968 = vmatprep.subr.mxu0 %v348_v12  ;;  %1004 = vmatprep.subr.mxu1 %v461_v17  ;;  %v666_v15 = vld [vmem:[%s1438_s7 + $0x40] sm:$0xff] }
  0x1b   : > { %969 = vmatpush3.msra.mxu0 %v348_v12  ;;  %1005 = vmatpush3.msra.mxu1 %v461_v17  ;;  %v669_v12 = vld [vmem:[%s1438_s7 + $0x58] sm:$0xff]  ;;  %v664_v17 = vld [vmem:[%s1438_s7 + $0x30] sm:$0xff] }
  0x1c   : > { %970 = vmatprep.subr.mxu0 %v347_v14  ;;  %1006 = vmatprep.subr.mxu1 %v460_v19 }
  0x1d   : > { %971 = vmatpush3.msra.mxu0 %v347_v14  ;;  %1007 = vmatpush3.msra.mxu1 %v460_v19  ;;  %v667_v14 = vld [vmem:[%s1438_s7 + $0x48] sm:$0xff] }
  0x1e   : > { %972 = vmatprep.subr.mxu0 %v346_v16  ;;  %1008 = vmatprep.subr.mxu1 %v459_v21 }
  0x1f   : > { %973 = vmatpush3.msra.mxu0 %v346_v16  ;;  %1009 = vmatpush3.msra.mxu1 %v459_v21  ;;  %v665_v16 = vld [vmem:[%s1438_s7 + $0x38] sm:$0xff] }
  0x20   : > { %974 = vmatprep.subr.mxu0 %v345_v18  ;;  %1010 = vmatprep.subr.mxu1 %v458_v23 }
  0x21   : > { %975 = vmatpush3.msra.mxu0 %v345_v18  ;;  %1011 = vmatpush3.msra.mxu1 %v458_v23  ;;  %v663_v18 = vld [vmem:[%s1438_s7 + $0x28] sm:$0xff] }
  0x22   : > { %976 = vmatprep.subr.mxu0 %v344_v20  ;;  %1012 = vmatprep.subr.mxu1 %v457_v25 }
  0x23   : > { %977 = vmatpush3.msra.mxu0 %v344_v20  ;;  %1013 = vmatpush3.msra.mxu1 %v457_v25  ;;  %v661_v25 = vld [vmem:[%s1438_s7 + $0x18] sm:$0xff] }
  0x24   : > { %978 = vmatprep.subr.mxu0 %v343_v22  ;;  %1014 = vmatprep.subr.mxu1 %v456_v27 }
  0x25   : > { %979 = vmatpush3.msra.mxu0 %v343_v22  ;;  %1015 = vmatpush3.msra.mxu1 %v456_v27  ;;  %v662_v22 = vld [vmem:[%s1438_s7 + $0x20] sm:$0xff] }
  0x26   : > { %980 = vmatprep.subr.mxu0 %v342_v24  ;;  %1016 = vmatprep.subr.mxu1 %v455_v32 }
  0x27   : > { %981 = vmatpush3.msra.mxu0 %v342_v24  ;;  %1017 = vmatpush3.msra.mxu1 %v455_v32 }
  0x28   : > { %982 = vmatprep.subr.mxu0 %v341_v26  ;;  %1018 = vmatprep.subr.mxu1 %v454_v33 }
  0x29   : > { %983 = vmatpush3.msra.mxu0 %v341_v26  ;;  %1019 = vmatpush3.msra.mxu1 %v454_v33  ;;  %v659_v33 = vld [vmem:[%s1438_s7 + $0x8] sm:$0xff] }
  0x2a   : > { %984 = vmatprep.subr.mxu0 %v340_v28  ;;  %1020 = vmatprep.subr.mxu1 %v453_v34 }
  0x2b   : > { %985 = vmatpush3.msra.mxu0 %v340_v28  ;;  %1021 = vmatpush3.msra.mxu1 %v453_v34  ;;  %v660_v28 = vld [vmem:[%s1438_s7 + $0x10] sm:$0xff] }
  0x2c   : > { %987 = vmatmul.mubr.f32.vlgmr.msra.gmra.mxu0 %v1297_v29  ;;  %1022 = vmatprep.subr.mxu1 %v452_v35 }
  0x2d   : > { %989 = vmatprep.mubr.f32.mxu0 %v1300_v30  ;;  %1023 = vmatpush3.msra.mxu1 %v452_v35  ;;  %v658_v35 = vld [vmem:[%s1438_s7] sm:$0xff] }
  0x2e   : > { %1113 = vset.pattern.permute.xlu1 %v1136_v2  ;;  %1114 = vset.pattern.permute.xlu0 %v1136_v2 }
  0x2f   : > { %1030 = vmatprep.subr.mxu0 %v673_v8  ;;  %1068 = vmatprep.subr.mxu1 %v673_v8 }
  0x30   : > { %990 = vmatmul.mubr.f32.gmra.mxu0 %v1305_v31 }
  0x31   : > { %1031 = vmatpush3.msra.mxu0 %v673_v8 }
  0x32   : > { %1032 = vmatprep.subr.mxu0 %v672_v9 }
  0x33   : > { %1033 = vmatpush3.msra.mxu0 %v672_v9 }
  0x34   : > { %1034 = vmatprep.subr.mxu0 %v671_v10 }
  0x35   : > { %1035 = vmatpush3.msra.mxu0 %v671_v10 }
  0x36   : > { %1036 = vmatprep.subr.mxu0 %v670_v11 }
  0x37   : > { %1037 = vmatpush3.msra.mxu0 %v670_v11 }
  0x38   : > { %1038 = vmatprep.subr.mxu0 %v669_v12 }
  0x39   : > { %1039 = vmatpush3.msra.mxu0 %v669_v12 }
  0x3a   : > { %1040 = vmatprep.subr.mxu0 %v668_v13 }
  0x3b   : > { %1041 = vmatpush3.msra.mxu0 %v668_v13 }
  0x3c   : > { %1042 = vmatprep.subr.mxu0 %v667_v14 }
  0x3d   : > { %1043 = vmatpush3.msra.mxu0 %v667_v14 }
  0x3e   : > { %1044 = vmatprep.subr.mxu0 %v666_v15 }
  0x3f   : > { %1045 = vmatpush3.msra.mxu0 %v666_v15 }
  0x40   : > { %1046 = vmatprep.subr.mxu0 %v665_v16 }
  0x41   : > { %1047 = vmatpush3.msra.mxu0 %v665_v16 }
  0x42   : > { %1048 = vmatprep.subr.mxu0 %v664_v17 }
  0x43   : > { %1049 = vmatpush3.msra.mxu0 %v664_v17 }
  0x44   : > { %1050 = vmatprep.subr.mxu0 %v663_v18 }
  0x45   : > { %1051 = vmatpush3.msra.mxu0 %v663_v18 }
  0x46   : > { %1052 = vmatprep.subr.mxu0 %v662_v22 }
  0x47   : > { %1053 = vmatpush3.msra.mxu0 %v662_v22 }
  0x48   : > { %1054 = vmatprep.subr.mxu0 %v661_v25 }
  0x49   : > { %1055 = vmatpush3.msra.mxu0 %v661_v25 }
  0x4a   : > { %1056 = vmatprep.subr.mxu0 %v660_v28 }
  0x4b   : > { %1057 = vmatpush3.msra.mxu0 %v660_v28 }
  0x4c   : > { %1058 = vmatprep.subr.mxu0 %v659_v33 }
  0x4d   : > { %1059 = vmatpush3.msra.mxu0 %v659_v33 }
  0x4e   : > { %1060 = vmatprep.subr.mxu0 %v658_v35 }
  0x4f   : > { %1061 = vmatpush3.msra.mxu0 %v658_v35 }
  0xec   : > { %v988_v37 = vpop.f32.mrf.mxu0 }
  0xed   : > { %v435_v38 = vadd.f32 %v988_v37, %v887_v36 }
  0xee   : > { %v429_v39 = vpop.f32.mrf.mxu0 }
  0xef   : > { %v430_v40 = vadd.f32 %v887_v36, %v429_v39  ;;  %v449_v44 = vmax.f32 %v435_v38, 0.0 }
  0xf0   : > { %v991_v41 = vpop.f32.mrf.mxu0 }
  0xf1   : > { %v445_v42 = vadd.f32 %v991_v41, %v887_v36  ;;  %v448_v43 = vmax.f32 %v430_v40, 0.0  ;;  %v889_v41 = vld [vmem:[%s1436_s5] ss:$0 sm:$0xff] }
  0xf2   : > { %v439_v45 = vpop.f32.mrf.mxu0 }
  0xf3   : > { %v440_v46 = vadd.f32 %v887_v36, %v439_v45  ;;  %1024 = vmatprep.mubr.f32.mxu1 %v448_v43  ;;  %v451_v47 = vmax.f32 %v445_v42, 0.0 }
  0xf4   : > { %1025 = vmatmul.mubr.f32.vlgmr.msra.gmra.mxu1 %v449_v44  ;;  %v890_v44 = vld [vmem:[%s1437_s6] ss:$0 sm:$0xff] }
  0xf5   : > { %v450_v48 = vmax.f32 %v440_v46, 0.0  ;;  %1084 = vmatpush3.msra.mxu1 %v673_v8 }
  0xf6   : > { %1069 = vmatprep.subr.mxu1 %v672_v9 }
  0xf7   : > { %1027 = vmatprep.mubr.f32.mxu1 %v450_v48  ;;  %1085 = vmatpush3.msra.mxu1 %v672_v9 }
  0xf8   : > { %1028 = vmatmul.mubr.f32.gmra.mxu1 %v451_v47  ;;  %1070 = vmatprep.subr.mxu1 %v671_v10 }
  0xf9   : > { %1086 = vmatpush3.msra.mxu1 %v671_v10 }
  0xfa   : > { %1071 = vmatprep.subr.mxu1 %v670_v11 }
  0xfb   : > { %1087 = vmatpush3.msra.mxu1 %v670_v11 }
  0xfc   : > { %1072 = vmatprep.subr.mxu1 %v669_v12 }
  0xfd   : > { %1088 = vmatpush3.msra.mxu1 %v669_v12 }
  0xfe   : > { %1073 = vmatprep.subr.mxu1 %v668_v13 }
  0xff   : > { %1089 = vmatpush3.msra.mxu1 %v668_v13 }
 0x100   : > { %1074 = vmatprep.subr.mxu1 %v667_v14 }
 0x101   : > { %1090 = vmatpush3.msra.mxu1 %v667_v14 }
 0x102   : > { %1075 = vmatprep.subr.mxu1 %v666_v15 }
 0x103   : > { %1091 = vmatpush3.msra.mxu1 %v666_v15 }
 0x104   : > { %1076 = vmatprep.subr.mxu1 %v665_v16 }
 0x105   : > { %1092 = vmatpush3.msra.mxu1 %v665_v16 }
 0x106   : > { %1077 = vmatprep.subr.mxu1 %v664_v17 }
 0x107   : > { %1093 = vmatpush3.msra.mxu1 %v664_v17 }
 0x108   : > { %1078 = vmatprep.subr.mxu1 %v663_v18 }
 0x109   : > { %1094 = vmatpush3.msra.mxu1 %v663_v18 }
 0x10a   : > { %1079 = vmatprep.subr.mxu1 %v662_v22 }
 0x10b   : > { %1095 = vmatpush3.msra.mxu1 %v662_v22 }
 0x10c   : > { %1080 = vmatprep.subr.mxu1 %v661_v25 }
 0x10d   : > { %1096 = vmatpush3.msra.mxu1 %v661_v25 }
 0x10e   : > { %1081 = vmatprep.subr.mxu1 %v660_v28 }
 0x10f   : > { %1097 = vmatpush3.msra.mxu1 %v660_v28 }
 0x110   : > { %1082 = vmatprep.subr.mxu1 %v659_v33 }
 0x111   : > { %1098 = vmatpush3.msra.mxu1 %v659_v33 }
 0x112   : > { %1083 = vmatprep.subr.mxu1 %v658_v35 }
 0x113   : > { %1099 = vmatpush3.msra.mxu1 %v658_v35 }
 0x1b4   : > { %v1026_v50 = vpop.f32.mrf.mxu1 }
 0x1b5   : > { %v1326_v51 = vadd.f32 %v1026_v50, %v888_v49 }
 0x1b6   : > { %v541_v52 = vpop.f32.mrf.mxu1 }
 0x1b7   : > { %v561_v53 = vmul.f32 1e-05, %v1326_v51  ;;  %v1329_v54 = vadd.f32 %v888_v49, %v541_v52  ;;  %598 = vrot.lane.b32.xlu1 %v1326_v51, %s1135_s12 }
 0x1b8   : > { %v1029_v55 = vpop.f32.mrf.mxu1 }
 0x1b9   : > { %v566_v56 = vmul.f32 1.442695, %v561_v53  ;;  %v560_v57 = vmul.f32 1e-05, %v1329_v54  ;;  %v1334_v58 = vadd.f32 %v1029_v55, %v888_v49 }
 0x1ba   : > { %v551_v59 = vpop.f32.mrf.mxu1 }
 0x1bb   : > { %1119 = vpow2.f32 %v566_v56  ;;  %v564_v60 = vmul.f32 1.442695, %v560_v57  ;;  %v563_v61 = vmul.f32 1e-05, %v1334_v58  ;;  %v1337_v62 = vadd.f32 %v888_v49, %v551_v59  ;;  %596 = vrot.lane.b32.xlu1 %v1329_v54, %s1135_s12 }
 0x1bd   : > { %v562_v63 = vmul.f32 1e-05, %v1337_v62  ;;  %1121 = vpow2.f32 %v564_v60  ;;  %v570_v0 = vmul.f32 1.442695, %v563_v61  ;;  %v766_v60 = vlaneseq }
 0x1bf   : > { %v568_v1 = vmul.f32 1.442695, %v562_v63 }
 0x1c1   : > { %1123 = vpow2.f32 %v568_v1  ;;  %v891_v1 = vld [vmem:[%s1439_s8] ss:$0 sm:$0xff] }
 0x1c2   : > { %1125 = vpow2.f32 %v570_v0 }
 0x1c8   : > { %v1120_v3 = vpop.eup %1119 }
 0x1c9   : > { %578 = vrot.lane.b32.xlu0 %v1120_v3, %s1137_s13 }
 0x1ca   : > { %v1122_v4 = vpop.eup %1121 }
 0x1cd   : > { %576 = vrot.lane.b32.xlu0 %v1122_v4, %s1137_s13 }
 0x1ce   : > { %v1124_v5 = vpop.eup %1123 }
 0x1cf   : > { %580 = vrot.lane.b32.xlu1 %v1124_v5, %s1137_s13  ;;  %v1126_v6 = vpop.eup %1125 }
 0x1d1   : > { %582 = vrot.lane.b32.xlu0 %v1126_v6, %s1137_s13 }
 0x1d3   : > { %602 = vrot.lane.b32.xlu1 %v1334_v58, %s1135_s12 }
 0x1d5   : > { %600 = vrot.lane.b32.xlu0 %v1337_v62, %s1135_s12 }
 0x229   : > { %v599_v19 = vpop.permute.xlu1 %598 }
 0x22d   : > { %v597_v23 = vpop.permute.xlu1 %596 }
 0x23b   : > { %v579_v20 = vpop.permute.xlu0 %578 }
 0x23c   : > { %v589_v21 = vmul.f32 %v579_v20, %v1297_v29 }
 0x23e   : > { %v609_v24 = vadd.f32 %v599_v19, %v589_v21 }
 0x23f   : > { %v577_v26 = vpop.permute.xlu0 %576 }
 0x240   : > { %v588_v27 = vmul.f32 %v577_v26, %v1230_v7  ;;  %620 = vperm.xlu1 %1113, %v609_v24  }
 0x241   : > { %v581_v29 = vpop.permute.xlu1 %580 }
 0x242   : > { %v608_v32 = vadd.f32 %v597_v23, %v588_v27  ;;  %v590_v37 = vmul.f32 %v581_v29, %v1300_v30  ;;  %v1139_v30 = vmov 1  }
 0x243   : > { %v583_v34 = vpop.permute.xlu0 %582 }
 0x244   : > { %v591_v7 = vmul.f32 %v583_v34, %v1305_v31  ;;  %615 = vperm.xlu0 %1114, %v608_v32   ;;  %v1138_v31 = vmov 0  }
 0x245   : > { %v603_v36 = vpop.permute.xlu1 %602 }
 0x246   : > { %v611_v38 = vadd.f32 %v603_v36, %v591_v7 }
 0x247   : > { %v601_v39 = vpop.permute.xlu0 %600 }
 0x248   : > { %v610_v40 = vadd.f32 %v601_v39, %v590_v37  ;;  %630 = vperm.xlu0 %1114, %v611_v38  }
 0x24a   : > { %625 = vperm.xlu1 %1113, %v610_v40  }
 0x24c   : > { %1116 = vset.pattern.permute.xlu0 %v1138_v31 }
 0x24d   : > { %774 = vperm.xlu0 %1116, %v1326_v51  }
 0x24e   : > { %1115 = vset.pattern.permute.xlu1 %v1138_v31 }
 0x24f   : > { %770 = vperm.xlu1 %1115, %v1329_v54  }
 0x251   : > { %782 = vperm.xlu0 %1116, %v1334_v58  }
 0x253   : > { %778 = vperm.xlu1 %1115, %v1337_v62  }
 0x255   : > { %1118 = vset.pattern.permute.xlu0 %v1139_v30 }
 0x256   : > { %803 = vperm.xlu0 %1118, %v1337_v62   ;;  %v767_v62 = vand.u32 127, %v766_v60 }
 0x257   : > { %1117 = vset.pattern.permute.xlu1 %v1139_v30 }
 0x258   : > { %795 = vperm.xlu1 %1117, %v1329_v54   ;;  %vm768_vm0 = vcmp.eq.s32.totalorder %v767_v62, 100  ;;  %vm793_vm1 = vcmp.eq.s32.totalorder %v767_v62, 101 }
 0x25c   : > { %799 = vperm.xlu1 %1117, %v1326_v51  }
 0x260   : > { %807 = vperm.xlu1 %1117, %v1334_v58  }
 0x2bb   : > { %v621_v42 = vpop.permute.xlu1 %620 }
 0x2bc   : > { %v640_v43 = vmul.f32 %v889_v41, %v621_v42 }
 0x2be   : > { %v651_v47 = vadd.f32 %v890_v44, %v640_v43 }
 0x2bf   : > { %v616_v45 = vpop.permute.xlu0 %615 }
 0x2c0   : > { %v639_v46 = vmul.f32 %v889_v41, %v616_v45  ;;  %v655_v51 = vmax.f32 %v651_v47, 0.0 }
 0x2c2   : > { %v650_v48 = vadd.f32 %v890_v44, %v639_v46 }
 0x2c3   : > { %v631_v49 = vpop.permute.xlu0 %630 }
 0x2c4   : > { %v654_v50 = vmax.f32 %v650_v48, 0.0  ;;  %v642_v52 = vmul.f32 %v889_v41, %v631_v49 }
 0x2c5   : > { %v626_v53 = vpop.permute.xlu1 %625 }
 0x2c6   : > { %v641_v54 = vmul.f32 %v889_v41, %v626_v53  ;;  %1062 = vmatprep.mubr.f32.mxu0 %v654_v50  ;;  %v653_v55 = vadd.f32 %v890_v44, %v642_v52 }
 0x2c7   : > { %1063 = vmatmul.mubr.f32.vlgmr.msra.gmra.mxu0 %v655_v51 }
 0x2c8   : > { %v652_v56 = vadd.f32 %v890_v44, %v641_v54  ;;  %v657_v58 = vmax.f32 %v653_v55, 0.0  ;;  %v775_v63 = vpop.permute.xlu0 %774 }
 0x2c9   : > { %v786_v5 = vsel %vm768_vm0, %v775_v63, 0.0 }
 0x2ca   : > { %v656_v57 = vmax.f32 %v652_v56, 0.0  ;;  %v771_v59 = vpop.permute.xlu1 %770 }
 0x2cb   : > { %v785_v9 = vsel %vm768_vm0, %v771_v59, 0.0 }
 0x2cc   : > { %1065 = vmatprep.mubr.f32.mxu1 %v656_v57  ;;  %v783_v6 = vpop.permute.xlu0 %782 }
 0x2cd   : > { %1066 = vmatmul.mubr.f32.vlgmr.msra.gmra.mxu1 %v657_v58  ;;  %v788_v20 = vsel %vm768_vm0, %v783_v6, 0.0 }
 0x2ce   : > { %v779_v61 = vpop.permute.xlu1 %778 }
 0x2cf   : > { %v787_v23 = vsel %vm768_vm0, %v779_v61, 0.0 }
 0x2d1   : > { %v804_v21 = vpop.permute.xlu0 %803 }
 0x2d2   : > { %v812_v27 = vsel %vm793_vm1, %v804_v21, 0.0 }
 0x2d3   : > { %v796_v0 = vpop.permute.xlu1 %795 }
 0x2d4   : > { %v810_v13 = vsel %vm793_vm1, %v796_v0, 0.0 }
 0x2d7   : > { %v800_v10 = vpop.permute.xlu1 %799 }
 0x2d8   : > { %v811_v15 = vsel %vm793_vm1, %v800_v10, 0.0 }
 0x2db   : > { %v808_v24 = vpop.permute.xlu1 %807 }
 0x2dc   : > { %v813_v28 = vsel %vm793_vm1, %v808_v24, 0.0 }
 0x387   : > { %v1064_v2 = vpop.f32.mrf.mxu0 }
 0x388   : > { %v753_v3 = vadd.f32 %v1064_v2, %v891_v1 }
 0x389   : > { %v747_v4 = vpop.f32.mrf.mxu0 }
 0x38a   : > { %v748_v8 = vadd.f32 %v891_v1, %v747_v4  ;;  %v790_v11 = vadd.f32 %v786_v5, %v753_v3 }
 0x38c   : > { %v789_v12 = vadd.f32 %v785_v9, %v748_v8  ;;  %v815_v18 = vadd.f32 %v811_v15, %v790_v11 }
 0x38d   : > { %v1067_v14 = vpop.f32.mrf.mxu1 }
 0x38e   : > { %v814_v16 = vadd.f32 %v810_v13, %v789_v12  ;;  %v763_v17 = vadd.f32 %v1067_v14, %v891_v1  ;;  %819 = vst [vmem:[%s334_s19 + $0x8] sm:$0xff] %v815_v18 }
 0x38f   : > { %v757_v19 = vpop.f32.mrf.mxu1 }
 0x390   : > { %818 = vst [vmem:[%s334_s19] sm:$0xff] %v814_v16  ;;  %v758_v22 = vadd.f32 %v891_v1, %v757_v19  ;;  %v792_v25 = vadd.f32 %v788_v20, %v763_v17 }
 0x392   : > { %v791_v26 = vadd.f32 %v787_v23, %v758_v22  ;;  %v817_v32 = vadd.f32 %v813_v28, %v792_v25 }
 0x394   : > { %v816_v29 = vadd.f32 %v812_v27, %v791_v26  ;;  %821 = vst [vmem:[%s334_s19 + $0x18] sm:$0xff] %v817_v32 }
 0x396   : > { %820 = vst [vmem:[%s334_s19 + $0x10] sm:$0xff] %v816_v29 }
 0x397 PF: > { %s19_s30 = sadd.s32 1, %s1133_s30  }
 0x398   : > { %p16_p4 = scmp.ge.s32.totalorder %s19_s30, 4  }
 0x39a   :  { %18 = sbr.rel (!%p16_p4) target bundleno = 1 (0x1), region = 86 }

</bundles_post_ra>
